<compile_context>
chip_gen: v5e
topology: v5e:2x2
jax: 0.10.0
libtpu: 0.0.40
codegen_flags: <defaults>
</compile_context>

<pallas_src>
import functools

import jax
import jax.numpy as jnp
from jax.experimental import pallas as pl
from jax.experimental.pallas import tpu as pltpu

LANE = 128                              # lane width / lane-dense padding target
ROW_PAD = 16                            # bf16 native sublane tile = (16, 128)
VMEM_LIMIT = 48 * 1024 * 1024           # safe on v7x (64 MiB/TC) and v5e/v6e
XW_RESIDENT_BYTES = 12 * 1024 * 1024    # per-buffer cap for a VMEM-resident XWn


def _round_up(x, m):
    return ((x + m - 1) // m) * m


def _pick_row_tile(m_pad, cap, min_blocks=1):
    """Largest multiple of ROW_PAD <= cap that divides m_pad, preferring a
    split into >= min_blocks row blocks (so the 'parallel' axis can shard
    across both v7x TensorCores)."""
    best = ROW_PAD
    t = ROW_PAD
    while t <= min(cap, m_pad):
        if m_pad % t == 0 and (m_pad // t >= min_blocks or t == ROW_PAD):
            best = t
        t += ROW_PAD
    return best


# --------------------------------------------------------------------------
# Kernel 1: neighbor projection  XWn = X @ Wn^T   (computed ONCE per layer)
# --------------------------------------------------------------------------
def _project_kernel(x_ref, w_ref, o_ref):
    o_ref[...] = jnp.dot(x_ref[...], w_ref[...],
                         preferred_element_type=jnp.float32).astype(o_ref.dtype)


def project_neighbors(x_p, w_t_p, *, tr_cap=512):
    """(N_pad, F_pad) @ (F_pad, E_pad) -> (N_pad, E_pad) bf16."""
    N_pad, F_pad = x_p.shape
    E_pad = w_t_p.shape[1]
    tr = _pick_row_tile(N_pad, tr_cap)
    grid = (N_pad // tr,)

    flops = 2 * N_pad * F_pad * E_pad
    bytes_accessed = (x_p.size + w_t_p.size + N_pad * E_pad) * 2  # bf16

    return pl.pallas_call(
        _project_kernel,
        out_shape=jax.ShapeDtypeStruct((N_pad, E_pad), jnp.bfloat16),
        grid_spec=pltpu.PrefetchScalarGridSpec(
            num_scalar_prefetch=0,
            grid=grid,
            in_specs=[pl.BlockSpec((tr, F_pad), lambda i: (i, 0)),
                      pl.BlockSpec((F_pad, E_pad), lambda i: (0, 0))],
            out_specs=pl.BlockSpec((tr, E_pad), lambda i: (i, 0)),
        ),
        compiler_params=pltpu.CompilerParams(
            dimension_semantics=("parallel",),
            vmem_limit_bytes=VMEM_LIMIT,
        ),
        cost_estimate=pl.CostEstimate(flops=flops, transcendentals=0,
                                      bytes_accessed=bytes_accessed),
    )(x_p, w_t_p)


# --------------------------------------------------------------------------
# Kernel 2: GraphSAGE layer (self matmul + A @ XWn + relu [+ classifier])
# --------------------------------------------------------------------------
def _make_sage_kernel(with_classifier, xw_resident, tk):
    """refs: s (tm,Fp)  a (tm,tk)  xw (N_pad,Ep)|(tk,Ep)  ws (Fp,Ep)
             [wc (Ep,Cp)]  o (tm,Ep|Cp)   scratch: acc (tm,Ep) f32"""

    def kernel(*refs):
        if with_classifier:
            s_ref, a_ref, xw_ref, ws_ref, wc_ref, o_ref, acc_ref = refs
        else:
            s_ref, a_ref, xw_ref, ws_ref, o_ref, acc_ref = refs

        k = pl.program_id(1)

        @pl.when(k == 0)
        def _init():
            # self contribution: (tm,Fp) @ (Fp,Ep), bf16 MXU, f32 accumulate
            acc_ref[...] = jnp.dot(s_ref[...], ws_ref[...],
                                   preferred_element_type=jnp.float32)

        if xw_resident:
            # full XWn resident in VMEM (DMA'd once); slice the k-th band
            start = pl.multiple_of(k * tk, LANE)
            xw = xw_ref[pl.ds(start, tk), :]
        else:
            xw = xw_ref[...]
        acc_ref[...] += jnp.dot(a_ref[...], xw,
                                preferred_element_type=jnp.float32)

        @pl.when(k == pl.num_programs(1) - 1)
        def _finalize():
            h = jnp.maximum(acc_ref[...], 0.0)            # relu in f32
            if with_classifier:
                o_ref[...] = jnp.dot(h.astype(wc_ref.dtype), wc_ref[...],
                                     preferred_element_type=jnp.float32
                                     ).astype(o_ref.dtype)
            else:
                o_ref[...] = h.astype(o_ref.dtype)

    return kernel


def sage_layer(self_feats_p, adj_p, xw_p, w_self_t_p, w_cls_t_p=None, *,
               tm, tk, out_dtype=jnp.float32):
    """One GraphSAGE layer on pre-padded bf16 operands.

    self_feats_p : (M_pad, Fp)     target-node features
    adj_p        : (M_pad, N_pad)  row-normalized mean-aggregation matrix
    xw_p         : (N_pad, E_pad)  pre-projected neighbor features X @ Wn^T
    w_self_t_p   : (Fp, E_pad)     transposed self weight
    w_cls_t_p    : (E_pad, C_pad)  transposed classifier weight (fused if given)
    """
    M_pad, Fp = self_feats_p.shape
    N_pad, E_pad = xw_p.shape
    assert adj_p.shape == (M_pad, N_pad)
    assert M_pad % tm == 0 and N_pad % tk == 0

    with_cls = w_cls_t_p is not None
    out_cols = w_cls_t_p.shape[1] if with_cls else E_pad

    # Keep XWn resident in VMEM when small enough (v7x-safe budget),
    # otherwise stream (tk, E_pad) tiles along the reduction axis.
    xw_bytes = N_pad * E_pad * jnp.dtype(xw_p.dtype).itemsize
    xw_resident = xw_bytes <= XW_RESIDENT_BYTES

    grid = (M_pad // tm, N_pad // tk)

    in_specs = [
        pl.BlockSpec((tm, Fp), lambda i, k: (i, 0)),        # self feats row tile
        pl.BlockSpec((tm, tk), lambda i, k: (i, k)),        # adjacency tile
        (pl.BlockSpec((N_pad, E_pad), lambda i, k: (0, 0)) if xw_resident
         else pl.BlockSpec((tk, E_pad), lambda i, k: (k, 0))),  # XWn
        pl.BlockSpec((Fp, E_pad), lambda i, k: (0, 0)),     # W_self^T
    ]
    args = [self_feats_p, adj_p, xw_p, w_self_t_p]
    if with_cls:
        in_specs.append(pl.BlockSpec((E_pad, out_cols), lambda i, k: (0, 0)))
        args.append(w_cls_t_p)

    elem = 2  # bf16 operands
    out_itemsize = jnp.dtype(out_dtype).itemsize
    bytes_accessed = (self_feats_p.size * elem + adj_p.size * elem
                      + (xw_p.size if xw_resident else grid[0] * xw_p.size) * elem
                      + w_self_t_p.size * elem
                      + (w_cls_t_p.size * elem if with_cls else 0)
                      + M_pad * out_cols * out_itemsize)
    flops = (2 * M_pad * Fp * E_pad                 # self matmul
             + 2 * M_pad * N_pad * E_pad            # A @ XWn
             + (2 * M_pad * E_pad * out_cols if with_cls else 0))

    return pl.pallas_call(
        _make_sage_kernel(with_cls, xw_resident, tk),
        out_shape=jax.ShapeDtypeStruct((M_pad, out_cols), out_dtype),
        grid_spec=pltpu.PrefetchScalarGridSpec(
            num_scalar_prefetch=0,
            grid=grid,
            in_specs=in_specs,
            out_specs=pl.BlockSpec((tm, out_cols), lambda i, k: (i, 0)),
            scratch_shapes=[pltpu.VMEM((tm, E_pad), jnp.float32)],
        ),
        compiler_params=pltpu.CompilerParams(
            dimension_semantics=("parallel", "arbitrary"),
            vmem_limit_bytes=VMEM_LIMIT,
        ),
        cost_estimate=pl.CostEstimate(flops=flops, transcendentals=0,
                                      bytes_accessed=bytes_accessed),
    )(*args)


# --------------------------------------------------------------------------
# One-time preparation: pad + cast static operands (outside the hot forward)
# --------------------------------------------------------------------------
def prepare_model(features, adj_norm, params, *, tm_cap=512, tk_cap=1024):
    N, F = features.shape
    E = params["w1_self_t"].shape[1]
    C = params["w_cls_t"].shape[1]

    F_pad = _round_up(F, LANE)
    E_pad = _round_up(E, LANE)
    C_pad = _round_up(C, LANE)

    tk = min(tk_cap, _round_up(N, LANE))
    N_pad = _round_up(N, tk)
    tm1 = _pick_row_tile(N_pad, tm_cap, min_blocks=2)   # layer-1 rows = all nodes

    def pad2(x, rows, cols):
        x = x.astype(jnp.bfloat16)
        pr, pc = rows - x.shape[0], cols - x.shape[1]
        if pr or pc:
            x = jnp.pad(x, ((0, pr), (0, pc)))
        return x

    prep = {
        "x":   pad2(features, N_pad, F_pad),
        "a":   pad2(adj_norm, N_pad, N_pad),
        "w1s": pad2(params["w1_self_t"], F_pad, E_pad),
        "w1n": pad2(params["w1_neigh_t"], F_pad, E_pad),
        "w2s": pad2(params["w2_self_t"], E_pad, E_pad),
        "w2n": pad2(params["w2_neigh_t"], E_pad, E_pad),
        "wc":  pad2(params["w_cls_t"], E_pad, C_pad),
    }
    meta = {"num_classes": C, "tm1": tm1, "tk": tk}
    return prep, meta


# --------------------------------------------------------------------------
# Model forward (graph glue / batch gathers in plain JAX)
# --------------------------------------------------------------------------
@functools.partial(jax.jit, static_argnames=("num_classes", "tm1", "tk", "tm_cap"))
def supervised_graphsage_forward(nodes, prep, *, num_classes, tm1, tk, tm_cap=512):
    x_p, a_p = prep["x"], prep["a"]

    # ---- layer 1 over ALL nodes (output kept bf16; only feeds MXU operands)
    xw1 = project_neighbors(x_p, prep["w1n"])                     # (N_pad, E_pad)
    h1 = sage_layer(x_p, a_p, xw1, prep["w1s"],
                    tm=tm1, tk=tk, out_dtype=jnp.bfloat16)        # (N_pad, E_pad)

    # ---- layer 2 over the batch nodes, classifier fused into the same kernel
    xw2 = project_neighbors(h1, prep["w2n"])                      # (N_pad, E_pad)

    B = nodes.shape[0]
    B_pad = _round_up(B, ROW_PAD)
    tm2 = _pick_row_tile(B_pad, tm_cap, min_blocks=2)

    # TODO(synk): fuse these row gathers into the layer-2 kernel via scalar
    #             prefetch (PrefetchScalarGridSpec + nodes) instead of XLA.
    self2 = h1[nodes]                      # (B, E_pad) bf16 gather
    adj2 = a_p[nodes]                      # (B, N_pad) bf16 gather
    if B_pad != B:
        self2 = jnp.pad(self2, ((0, B_pad - B), (0, 0)))
        adj2 = jnp.pad(adj2, ((0, B_pad - B), (0, 0)))

    scores_p = sage_layer(self2, adj2, xw2, prep["w2s"], prep["wc"],
                          tm=tm2, tk=tk, out_dtype=jnp.float32)
    return scores_p[:B, :num_classes]


# --------------------------------------------------------------------------
# Pure-JAX reference (same dense mean-aggregation semantics), for validation
# --------------------------------------------------------------------------
def reference_forward(nodes, features, adj_norm, params):
    h1 = jax.nn.relu(features @ params["w1_self_t"]
                     + (adj_norm @ features) @ params["w1_neigh_t"])
    h2 = jax.nn.relu(h1[nodes] @ params["w2_self_t"]
                     + (adj_norm[nodes] @ h1) @ params["w2_neigh_t"])
    return h2 @ params["w_cls_t"]


def xavier_uniform(key, shape):
    # torch.nn.init.xavier_uniform_ for 2-D: fan_out = shape[0], fan_in = shape[1]
    fan_out, fan_in = shape
    bound = jnp.sqrt(6.0 / (fan_in + fan_out))
    return jax.random.uniform(key, shape, jnp.float32, -bound, bound)


if __name__ == "__main__":
    N_NODES = 128
    FEAT_DIM = 32
    EMBED_DIM = 32
    NUM_CLASSES = 8
    BATCH = 32          # >= 2 row blocks for the layer-2 call (v7x megacore)

    key = jax.random.PRNGKey(0)
    k_feat, k_adj, k_w1, k_w2, k_wc = jax.random.split(key, 5)

    # Node features
    features = jax.random.normal(k_feat, (N_NODES, FEAT_DIM), jnp.float32)

    # Deterministic adjacency: sparse random edges + ring edges, no self loops.
    adj = (jax.random.uniform(k_adj, (N_NODES, N_NODES)) < 0.05).astype(jnp.float32)
    ring = jnp.roll(jnp.eye(N_NODES, dtype=jnp.float32), 1, axis=1)
    adj = jnp.clip(adj + ring, 0.0, 1.0)
    adj = adj * (1.0 - jnp.eye(N_NODES, dtype=jnp.float32))
    # Mean aggregator: row-normalize by neighbor count.
    adj_norm = adj / jnp.maximum(adj.sum(axis=1, keepdims=True), 1.0)

    # Parameters (xavier_uniform as in the PyTorch __init__), pre-transposed so
    # the kernels never transpose weights on the hot path.
    w1 = xavier_uniform(k_w1, (EMBED_DIM, 2 * FEAT_DIM))      # enc1.weight
    w2 = xavier_uniform(k_w2, (EMBED_DIM, 2 * EMBED_DIM))     # enc2.weight
    w_cls = xavier_uniform(k_wc, (NUM_CLASSES, EMBED_DIM))    # classifier weight
    params = {
        "w1_self_t": w1[:, :FEAT_DIM].T,        # (F, E)
        "w1_neigh_t": w1[:, FEAT_DIM:].T,       # (F, E)
        "w2_self_t": w2[:, :EMBED_DIM].T,       # (E, E)
        "w2_neigh_t": w2[:, EMBED_DIM:].T,      # (E, E)
        "w_cls_t": w_cls.T,                     # (E, C)
    }

    # One-time padding / bf16 cast of the static operands.
    prep, meta = prepare_model(features, adj_norm, params)

    nodes = jnp.arange(BATCH, dtype=jnp.int32)

    scores = supervised_graphsage_forward(
        nodes, prep, num_classes=meta["num_classes"],
        tm1=meta["tm1"], tk=meta["tk"])
    scores = jax.block_until_ready(scores)

    assert scores.shape == (BATCH, NUM_CLASSES)
    assert scores.dtype == jnp.float32
    assert bool(jnp.all(jnp.isfinite(scores)))

    # Validate against the f32 dense reference (bf16 MXU operands -> relaxed tol).
    ref = reference_forward(nodes, features, adj_norm, params)
    assert bool(jnp.allclose(scores, ref, atol=1e-1, rtol=1e-1))

    print("KERNEL_OK")
</pallas_src>

<mosaic_0001>
module attributes {stable_mosaic.version = 11 : i64} {
  func.func @_project_kernel(%arg0: i32, %arg1: memref<128x128xbf16, #tpu.memory_space<vmem>>, %arg2: memref<128x128xbf16, #tpu.memory_space<vmem>>, %arg3: memref<128x128xbf16, #tpu.memory_space<vmem>>) attributes {dimension_semantics = [#tpu.dimension_semantics<parallel>], iteration_bounds = array<i64: 1>, scalar_prefetch = 0 : i64, scratch_operands = 0 : i64, tpu.core_type = #tpu.core_type<tc>, window_params = [{transform_indices = @transform_0, window_bounds = array<i64: 128, 128>}, {pipeline_mode = #tpu.pipeline_mode<synchronous>, transform_indices = @transform_1, window_bounds = array<i64: 128, 128>}, {transform_indices = @transform_2, window_bounds = array<i64: 128, 128>}]} {
    %c0 = arith.constant 0 : index
    %c0_0 = arith.constant 0 : index
    %0 = vector.load %arg1[%c0, %c0_0] : memref<128x128xbf16, #tpu.memory_space<vmem>>, vector<128x128xbf16>
    %c0_1 = arith.constant 0 : index
    %c0_2 = arith.constant 0 : index
    %1 = vector.load %arg2[%c0_1, %c0_2] : memref<128x128xbf16, #tpu.memory_space<vmem>>, vector<128x128xbf16>
    %cst = arith.constant dense<0.000000e+00> : vector<128x128xf32>
    %2 = tpu.matmul %0, %1, %cst {dimension_numbers = #tpu.dot_dimension_numbers<[1], [0], [0], [1], [0, 0, 1, 1], [], []>} : vector<128x128xbf16>, vector<128x128xbf16>, vector<128x128xf32> -> vector<128x128xf32>
    %3 = arith.truncf %2 : vector<128x128xf32> to vector<128x128xbf16>
    %c0_3 = arith.constant 0 : index
    %c0_4 = arith.constant 0 : index
    %4 = vector.load %arg3[%c0_3, %c0_4] : memref<128x128xbf16, #tpu.memory_space<vmem>>, vector<128x128xbf16>
    tpu.vector_store %arg3[%c0_3, %c0_4], %3 {strides = array<i32>} : memref<128x128xbf16, #tpu.memory_space<vmem>>, vector<128x128xbf16>,
    return
  }
  func.func @transform_0(%arg0: i32) -> (i32, i32) {
    %c0_i32 = arith.constant 0 : i32
    %c0_i32_0 = arith.constant 0 : i32
    return %arg0, %c0_i32 : i32, i32
  }
  func.func @transform_1(%arg0: i32) -> (i32, i32) {
    %c0_i32 = arith.constant 0 : i32
    %c0_i32_0 = arith.constant 0 : i32
    %c0_i32_1 = arith.constant 0 : i32
    return %c0_i32, %c0_i32_0 : i32, i32
  }
  func.func @transform_2(%arg0: i32) -> (i32, i32) {
    %c0_i32 = arith.constant 0 : i32
    %c0_i32_0 = arith.constant 0 : i32
    return %arg0, %c0_i32 : i32, i32
  }
}

module attributes {stable_mosaic.version = 11 : i64} {
  func.func @kernel(%arg0: i32, %arg1: i32, %arg2: memref<64x128xbf16, #tpu.memory_space<vmem>>, %arg3: memref<64x128xbf16, #tpu.memory_space<vmem>>, %arg4: memref<128x128xbf16, #tpu.memory_space<vmem>>, %arg5: memref<128x128xbf16, #tpu.memory_space<vmem>>, %arg6: memref<64x128xbf16, #tpu.memory_space<vmem>>, %arg7: memref<64x128xf32, #tpu.memory_space<vmem>>) attributes {dimension_semantics = [#tpu.dimension_semantics<parallel>, #tpu.dimension_semantics<arbitrary>], iteration_bounds = array<i64: 2, 1>, scalar_prefetch = 0 : i64, scratch_operands = 1 : i64, tpu.core_type = #tpu.core_type<tc>, window_params = [{transform_indices = @transform_0, window_bounds = array<i64: 64, 128>}, {transform_indices = @transform_1, window_bounds = array<i64: 64, 128>}, {pipeline_mode = #tpu.pipeline_mode<synchronous>, transform_indices = @transform_2, window_bounds = array<i64: 128, 128>}, {pipeline_mode = #tpu.pipeline_mode<synchronous>, transform_indices = @transform_3, window_bounds = array<i64: 128, 128>}, {transform_indices = @transform_4, window_bounds = array<i64: 64, 128>}]} {
    %c0_i32 = arith.constant 0 : i32
    %0 = arith.cmpi eq, %arg1, %c0_i32 : i32
    %1 = arith.extui %0 : i1 to i32
    %c0_i32_0 = arith.constant 0 : i32
    %2 = arith.cmpi ne, %1, %c0_i32_0 : i32
    scf.if %2 {
      %c0_9 = arith.constant 0 : index
      %c0_10 = arith.constant 0 : index
      %15 = vector.load %arg2[%c0_9, %c0_10] : memref<64x128xbf16, #tpu.memory_space<vmem>>, vector<64x128xbf16>
      %c0_11 = arith.constant 0 : index
      %c0_12 = arith.constant 0 : index
      %16 = vector.load %arg5[%c0_11, %c0_12] : memref<128x128xbf16, #tpu.memory_space<vmem>>, vector<128x128xbf16>
      %cst_13 = arith.constant dense<0.000000e+00> : vector<64x128xf32>
      %17 = tpu.matmul %15, %16, %cst_13 {dimension_numbers = #tpu.dot_dimension_numbers<[1], [0], [0], [1], [0, 0, 1, 1], [], []>} : vector<64x128xbf16>, vector<128x128xbf16>, vector<64x128xf32> -> vector<64x128xf32>
      %c0_14 = arith.constant 0 : index
      %c0_15 = arith.constant 0 : index
      %18 = vector.load %arg7[%c0_14, %c0_15] : memref<64x128xf32, #tpu.memory_space<vmem>>, vector<64x128xf32>
      tpu.vector_store %arg7[%c0_14, %c0_15], %17 {strides = array<i32>} : memref<64x128xf32, #tpu.memory_space<vmem>>, vector<64x128xf32>,
    } else {
    }
    %c128_i32 = arith.constant 128 : i32
    %3 = arith.muli %arg1, %c128_i32 : i32
    %4 = tpu.assume_multiple %3, 128 : i32
    %5 = arith.index_cast %4 : i32 to index
    %c0 = arith.constant 0 : index
    %6 = vector.load %arg4[%5, %c0] : memref<128x128xbf16, #tpu.memory_space<vmem>>, vector<128x128xbf16>
    %c0_1 = arith.constant 0 : index
    %c0_2 = arith.constant 0 : index
    %7 = vector.load %arg7[%c0_1, %c0_2] : memref<64x128xf32, #tpu.memory_space<vmem>>, vector<64x128xf32>
    %c0_3 = arith.constant 0 : index
    %c0_4 = arith.constant 0 : index
    %8 = vector.load %arg3[%c0_3, %c0_4] : memref<64x128xbf16, #tpu.memory_space<vmem>>, vector<64x128xbf16>
    %cst = arith.constant dense<0.000000e+00> : vector<64x128xf32>
    %9 = tpu.matmul %8, %6, %cst {dimension_numbers = #tpu.dot_dimension_numbers<[1], [0], [0], [1], [0, 0, 1, 1], [], []>} : vector<64x128xbf16>, vector<128x128xbf16>, vector<64x128xf32> -> vector<64x128xf32>
    %10 = arith.addf %7, %9 : vector<64x128xf32>
    %c0_5 = arith.constant 0 : index
    %c0_6 = arith.constant 0 : index
    %11 = vector.load %arg7[%c0_5, %c0_6] : memref<64x128xf32, #tpu.memory_space<vmem>>, vector<64x128xf32>
    tpu.vector_store %arg7[%c0_5, %c0_6], %10 {strides = array<i32>} : memref<64x128xf32, #tpu.memory_space<vmem>>, vector<64x128xf32>,
    %c0_i32_7 = arith.constant 0 : i32
    %12 = arith.cmpi eq, %arg1, %c0_i32_7 : i32
    %13 = arith.extui %12 : i1 to i32
    %c0_i32_8 = arith.constant 0 : i32
    %14 = arith.cmpi ne, %13, %c0_i32_8 : i32
    scf.if %14 {
      %c0_9 = arith.constant 0 : index
      %c0_10 = arith.constant 0 : index
      %15 = vector.load %arg7[%c0_9, %c0_10] : memref<64x128xf32, #tpu.memory_space<vmem>>, vector<64x128xf32>
      %cst_11 = arith.constant 0.000000e+00 : f32
      %16 = vector.broadcast %cst_11 : f32 to vector<64x128xf32>
      %17 = arith.maximumf %15, %16 : vector<64x128xf32>
      %18 = arith.truncf %17 : vector<64x128xf32> to vector<64x128xbf16>
      %c0_12 = arith.constant 0 : index
      %c0_13 = arith.constant 0 : index
      %19 = vector.load %arg6[%c0_12, %c0_13] : memref<64x128xbf16, #tpu.memory_space<vmem>>, vector<64x128xbf16>
      tpu.vector_store %arg6[%c0_12, %c0_13], %18 {strides = array<i32>} : memref<64x128xbf16, #tpu.memory_space<vmem>>, vector<64x128xbf16>,
    } else {
    }
    return
  }
  func.func @transform_0(%arg0: i32, %arg1: i32) -> (i32, i32) {
    %c0_i32 = arith.constant 0 : i32
    %c0_i32_0 = arith.constant 0 : i32
    return %arg0, %c0_i32 : i32, i32
  }
  func.func @transform_1(%arg0: i32, %arg1: i32) -> (i32, i32) {
    %c0_i32 = arith.constant 0 : i32
    return %arg0, %arg1 : i32, i32
  }
  func.func @transform_2(%arg0: i32, %arg1: i32) -> (i32, i32) {
    %c0_i32 = arith.constant 0 : i32
    %c0_i32_0 = arith.constant 0 : i32
    %c0_i32_1 = arith.constant 0 : i32
    return %c0_i32, %c0_i32_0 : i32, i32
  }
  func.func @transform_3(%arg0: i32, %arg1: i32) -> (i32, i32) {
    %c0_i32 = arith.constant 0 : i32
    %c0_i32_0 = arith.constant 0 : i32
    %c0_i32_1 = arith.constant 0 : i32
    return %c0_i32, %c0_i32_0 : i32, i32
  }
  func.func @transform_4(%arg0: i32, %arg1: i32) -> (i32, i32) {
    %c0_i32 = arith.constant 0 : i32
    %c0_i32_0 = arith.constant 0 : i32
    return %arg0, %c0_i32 : i32, i32
  }
}

module attributes {stable_mosaic.version = 11 : i64} {
  func.func @kernel(%arg0: i32, %arg1: i32, %arg2: memref<16x128xbf16, #tpu.memory_space<vmem>>, %arg3: memref<16x128xbf16, #tpu.memory_space<vmem>>, %arg4: memref<128x128xbf16, #tpu.memory_space<vmem>>, %arg5: memref<128x128xbf16, #tpu.memory_space<vmem>>, %arg6: memref<128x128xbf16, #tpu.memory_space<vmem>>, %arg7: memref<16x128xf32, #tpu.memory_space<vmem>>, %arg8: memref<16x128xf32, #tpu.memory_space<vmem>>) attributes {dimension_semantics = [#tpu.dimension_semantics<parallel>, #tpu.dimension_semantics<arbitrary>], iteration_bounds = array<i64: 2, 1>, scalar_prefetch = 0 : i64, scratch_operands = 1 : i64, tpu.core_type = #tpu.core_type<tc>, window_params = [{transform_indices = @transform_0, window_bounds = array<i64: 16, 128>}, {transform_indices = @transform_1, window_bounds = array<i64: 16, 128>}, {pipeline_mode = #tpu.pipeline_mode<synchronous>, transform_indices = @transform_2, window_bounds = array<i64: 128, 128>}, {pipeline_mode = #tpu.pipeline_mode<synchronous>, transform_indices = @transform_3, window_bounds = array<i64: 128, 128>}, {pipeline_mode = #tpu.pipeline_mode<synchronous>, transform_indices = @transform_4, window_bounds = array<i64: 128, 128>}, {transform_indices = @transform_5, window_bounds = array<i64: 16, 128>}]} {
    %c0_i32 = arith.constant 0 : i32
    %0 = arith.cmpi eq, %arg1, %c0_i32 : i32
    %1 = arith.extui %0 : i1 to i32
    %c0_i32_0 = arith.constant 0 : i32
    %2 = arith.cmpi ne, %1, %c0_i32_0 : i32
    scf.if %2 {
      %c0_9 = arith.constant 0 : index
      %c0_10 = arith.constant 0 : index
      %15 = vector.load %arg2[%c0_9, %c0_10] : memref<16x128xbf16, #tpu.memory_space<vmem>>, vector<16x128xbf16>
      %c0_11 = arith.constant 0 : index
      %c0_12 = arith.constant 0 : index
      %16 = vector.load %arg5[%c0_11, %c0_12] : memref<128x128xbf16, #tpu.memory_space<vmem>>, vector<128x128xbf16>
      %cst_13 = arith.constant dense<0.000000e+00> : vector<16x128xf32>
      %17 = tpu.matmul %15, %16, %cst_13 {dimension_numbers = #tpu.dot_dimension_numbers<[1], [0], [0], [1], [0, 0, 1, 1], [], []>} : vector<16x128xbf16>, vector<128x128xbf16>, vector<16x128xf32> -> vector<16x128xf32>
      %c0_14 = arith.constant 0 : index
      %c0_15 = arith.constant 0 : index
      %18 = vector.load %arg8[%c0_14, %c0_15] : memref<16x128xf32, #tpu.memory_space<vmem>>, vector<16x128xf32>
      tpu.vector_store %arg8[%c0_14, %c0_15], %17 {strides = array<i32>} : memref<16x128xf32, #tpu.memory_space<vmem>>, vector<16x128xf32>,
    } else {
    }
    %c128_i32 = arith.constant 128 : i32
    %3 = arith.muli %arg1, %c128_i32 : i32
    %4 = tpu.assume_multiple %3, 128 : i32
    %5 = arith.index_cast %4 : i32 to index
    %c0 = arith.constant 0 : index
    %6 = vector.load %arg4[%5, %c0] : memref<128x128xbf16, #tpu.memory_space<vmem>>, vector<128x128xbf16>
    %c0_1 = arith.constant 0 : index
    %c0_2 = arith.constant 0 : index
    %7 = vector.load %arg8[%c0_1, %c0_2] : memref<16x128xf32, #tpu.memory_space<vmem>>, vector<16x128xf32>
    %c0_3 = arith.constant 0 : index
    %c0_4 = arith.constant 0 : index
    %8 = vector.load %arg3[%c0_3, %c0_4] : memref<16x128xbf16, #tpu.memory_space<vmem>>, vector<16x128xbf16>
    %cst = arith.constant dense<0.000000e+00> : vector<16x128xf32>
    %9 = tpu.matmul %8, %6, %cst {dimension_numbers = #tpu.dot_dimension_numbers<[1], [0], [0], [1], [0, 0, 1, 1], [], []>} : vector<16x128xbf16>, vector<128x128xbf16>, vector<16x128xf32> -> vector<16x128xf32>
    %10 = arith.addf %7, %9 : vector<16x128xf32>
    %c0_5 = arith.constant 0 : index
    %c0_6 = arith.constant 0 : index
    %11 = vector.load %arg8[%c0_5, %c0_6] : memref<16x128xf32, #tpu.memory_space<vmem>>, vector<16x128xf32>
    tpu.vector_store %arg8[%c0_5, %c0_6], %10 {strides = array<i32>} : memref<16x128xf32, #tpu.memory_space<vmem>>, vector<16x128xf32>,
    %c0_i32_7 = arith.constant 0 : i32
    %12 = arith.cmpi eq, %arg1, %c0_i32_7 : i32
    %13 = arith.extui %12 : i1 to i32
    %c0_i32_8 = arith.constant 0 : i32
    %14 = arith.cmpi ne, %13, %c0_i32_8 : i32
    scf.if %14 {
      %c0_9 = arith.constant 0 : index
      %c0_10 = arith.constant 0 : index
      %15 = vector.load %arg8[%c0_9, %c0_10] : memref<16x128xf32, #tpu.memory_space<vmem>>, vector<16x128xf32>
      %cst_11 = arith.constant 0.000000e+00 : f32
      %16 = vector.broadcast %cst_11 : f32 to vector<16x128xf32>
      %17 = arith.maximumf %15, %16 : vector<16x128xf32>
      %18 = arith.truncf %17 : vector<16x128xf32> to vector<16x128xbf16>
      %c0_12 = arith.constant 0 : index
      %c0_13 = arith.constant 0 : index
      %19 = vector.load %arg6[%c0_12, %c0_13] : memref<128x128xbf16, #tpu.memory_space<vmem>>, vector<128x128xbf16>
      %cst_14 = arith.constant dense<0.000000e+00> : vector<16x128xf32>
      %20 = tpu.matmul %18, %19, %cst_14 {dimension_numbers = #tpu.dot_dimension_numbers<[1], [0], [0], [1], [0, 0, 1, 1], [], []>} : vector<16x128xbf16>, vector<128x128xbf16>, vector<16x128xf32> -> vector<16x128xf32>
      %c0_15 = arith.constant 0 : index
      %c0_16 = arith.constant 0 : index
      %21 = vector.load %arg7[%c0_15, %c0_16] : memref<16x128xf32, #tpu.memory_space<vmem>>, vector<16x128xf32>
      tpu.vector_store %arg7[%c0_15, %c0_16], %20 {strides = array<i32>} : memref<16x128xf32, #tpu.memory_space<vmem>>, vector<16x128xf32>,
    } else {
    }
    return
  }
  func.func @transform_0(%arg0: i32, %arg1: i32) -> (i32, i32) {
    %c0_i32 = arith.constant 0 : i32
    %c0_i32_0 = arith.constant 0 : i32
    return %arg0, %c0_i32 : i32, i32
  }
  func.func @transform_1(%arg0: i32, %arg1: i32) -> (i32, i32) {
    %c0_i32 = arith.constant 0 : i32
    return %arg0, %arg1 : i32, i32
  }
  func.func @transform_2(%arg0: i32, %arg1: i32) -> (i32, i32) {
    %c0_i32 = arith.constant 0 : i32
    %c0_i32_0 = arith.constant 0 : i32
    %c0_i32_1 = arith.constant 0 : i32
    return %c0_i32, %c0_i32_0 : i32, i32
  }
  func.func @transform_3(%arg0: i32, %arg1: i32) -> (i32, i32) {
    %c0_i32 = arith.constant 0 : i32
    %c0_i32_0 = arith.constant 0 : i32
    %c0_i32_1 = arith.constant 0 : i32
    return %c0_i32, %c0_i32_0 : i32, i32
  }
  func.func @transform_4(%arg0: i32, %arg1: i32) -> (i32, i32) {
    %c0_i32 = arith.constant 0 : i32
    %c0_i32_0 = arith.constant 0 : i32
    %c0_i32_1 = arith.constant 0 : i32
    return %c0_i32, %c0_i32_0 : i32, i32
  }
  func.func @transform_5(%arg0: i32, %arg1: i32) -> (i32, i32) {
    %c0_i32 = arith.constant 0 : i32
    %c0_i32_0 = arith.constant 0 : i32
    return %arg0, %c0_i32 : i32, i32
  }
}

module attributes {stable_mosaic.version = 11 : i64} {
  func.func @_project_kernel(%arg0: i32, %arg1: memref<128x128xbf16, #tpu.memory_space<vmem>>, %arg2: memref<128x128xbf16, #tpu.memory_space<vmem>>, %arg3: memref<128x128xbf16, #tpu.memory_space<vmem>>) attributes {dimension_semantics = [#tpu.dimension_semantics<parallel>], iteration_bounds = array<i64: 1>, scalar_prefetch = 0 : i64, scratch_operands = 0 : i64, tpu.core_type = #tpu.core_type<tc>, window_params = [{transform_indices = @transform_0, window_bounds = array<i64: 128, 128>}, {pipeline_mode = #tpu.pipeline_mode<synchronous>, transform_indices = @transform_1, window_bounds = array<i64: 128, 128>}, {transform_indices = @transform_2, window_bounds = array<i64: 128, 128>}]} {
    %c0 = arith.constant 0 : index
    %c0_0 = arith.constant 0 : index
    %0 = vector.load %arg1[%c0, %c0_0] : memref<128x128xbf16, #tpu.memory_space<vmem>>, vector<128x128xbf16>
    %c0_1 = arith.constant 0 : index
    %c0_2 = arith.constant 0 : index
    %1 = vector.load %arg2[%c0_1, %c0_2] : memref<128x128xbf16, #tpu.memory_space<vmem>>, vector<128x128xbf16>
    %cst = arith.constant dense<0.000000e+00> : vector<128x128xf32>
    %2 = tpu.matmul %0, %1, %cst {dimension_numbers = #tpu.dot_dimension_numbers<[1], [0], [0], [1], [0, 0, 1, 1], [], []>} : vector<128x128xbf16>, vector<128x128xbf16>, vector<128x128xf32> -> vector<128x128xf32>
    %3 = arith.truncf %2 : vector<128x128xf32> to vector<128x128xbf16>
    %c0_3 = arith.constant 0 : index
    %c0_4 = arith.constant 0 : index
    %4 = vector.load %arg3[%c0_3, %c0_4] : memref<128x128xbf16, #tpu.memory_space<vmem>>, vector<128x128xbf16>
    tpu.vector_store %arg3[%c0_3, %c0_4], %3 {strides = array<i32>} : memref<128x128xbf16, #tpu.memory_space<vmem>>, vector<128x128xbf16>,
    return
  }
  func.func @transform_0(%arg0: i32) -> (i32, i32) {
    %c0_i32 = arith.constant 0 : i32
    %c0_i32_0 = arith.constant 0 : i32
    return %arg0, %c0_i32 : i32, i32
  }
  func.func @transform_1(%arg0: i32) -> (i32, i32) {
    %c0_i32 = arith.constant 0 : i32
    %c0_i32_0 = arith.constant 0 : i32
    %c0_i32_1 = arith.constant 0 : i32
    return %c0_i32, %c0_i32_0 : i32, i32
  }
  func.func @transform_2(%arg0: i32) -> (i32, i32) {
    %c0_i32 = arith.constant 0 : i32
    %c0_i32_0 = arith.constant 0 : i32
    return %arg0, %c0_i32 : i32, i32
  }
}

</mosaic_0001>

<bundles_post_ra>
// kernel: supervised_graphsage_forward.4
= control target key start
LH: loop header
LB: loop body
LE: loop exit
PB: predicated region body
PF: predicated region fallthrough
CT: control target
= control target key end

     0   :  { %7 = vsyncpa [#allocation3], 0  ;;  %s514_s0 = inlined_call_operand.hbm [shape: bf16[128,128], index: 0, kind: input, shape index: {}]   ;;  %s515_s1 = inlined_call_operand.hbm [shape: bf16[128,128], index: 1, kind: input, shape index: {}]   ;;  %s516_s2 = inlined_call_operand.vmem [shape: bf16[128,128], index: 2, kind: output, shape index: {}]  }
   0x1   :  { %s13_s11 = sshll.u32 %s514_s0, 4  ;;  %s14_s11 = int_to_ptr.hbm [resolvable:$true] %s13_s11 }
   0x2   :  { %8 = vsyncpa [#allocation5], 0  ;;  %s465_s12 = smov [#allocation2]   ;;  %s26_s16 = sshll.u32 %s515_s1, 4  ;;  %s27_s16 = int_to_ptr.hbm [resolvable:$true] %s26_s16 }
   0x3   :  { %s15_s13 = sshll.u32 %s465_s12, 4  ;;  %s466_s17 = smov 64   ;;  %s16_s13 = int_to_ptr.vmem [resolvable:$true] %s15_s13 }
   0x4   :  { %s467_s18 = smov 4   ;;  %s468_s19 = smov [#allocation4]  }
   0x5   :  { %21 = dma.hbm_to_vmem [thread:$0]  %s14_s11, 1024, %s16_s13, [#allocation3], %s466_s17, %s466_s17, %s467_s18  }
   0x6   :  { %s28_s20 = sshll.u32 %s468_s19, 4  ;;  %s29_s20 = int_to_ptr.vmem [resolvable:$true] %s28_s20 }
   0x7   :  { %34 = dma.hbm_to_vmem [thread:$0]  %s27_s16, 1024, %s29_s20, [#allocation5], %s466_s17, %s466_s17, %s467_s18  }
   0x8   :  { %461 = dma.done.wait [#allocation3], 1024  }
   0x9   :  { %462 = vsyncadd [#allocation3], 4294966272 }
   0xa   :  { %463 = dma.done.wait [#allocation5], 1024  }
   0xb   :  { %464 = vsyncadd [#allocation5], 4294966272  ;;  %v337_v0 = vld [vmem:[#allocation4 + $0x38] sm:$0xff]  ;;  %v336_v1 = vld [vmem:[#allocation4 + $0x30] sm:$0xff] }
   0xc   :  { %171 = vmatpush.bf16.msra.mxu0 %v337_v0  ;;  %385 = vmatpush.bf16.msra.mxu1 %v337_v0  ;;  %v335_v2 = vld [vmem:[#allocation4 + $0x28] sm:$0xff]  ;;  %v334_v3 = vld [vmem:[#allocation4 + $0x20] sm:$0xff]  ;;  %v333_v4 = vld [vmem:[#allocation4 + $0x18] sm:$0xff] }
   0xd   :  { %386 = vmatpush.bf16.msra.mxu2 %v337_v0  ;;  %387 = vmatpush.bf16.msra.mxu3 %v337_v0  ;;  %v332_v5 = vld [vmem:[#allocation4 + $0x10] sm:$0xff]  ;;  %v331_v6 = vld [vmem:[#allocation4 + $0x8] sm:$0xff]  ;;  %v330_v7 = vld [vmem:[#allocation4] sm:$0xff] }
   0xe   :  { %v322_v8 = vld [vmem:[#allocation2] sm:$0xff]  ;;  %v324_v9 = vld [vmem:[#allocation2 + $0x10] sm:$0xff]  ;;  %v323_v12 = vld [vmem:[#allocation2 + $0x8] sm:$0xff] }
   0xf   :  { %v326_v10 = vld [vmem:[#allocation2 + $0x20] sm:$0xff]  ;;  %v328_v11 = vld [vmem:[#allocation2 + $0x30] sm:$0xff]  ;;  %v325_v13 = vld [vmem:[#allocation2 + $0x18] sm:$0xff] }
  0x10   :  { %172 = vmatpush.bf16.msra.mxu0 %v336_v1  ;;  %388 = vmatpush.bf16.msra.mxu1 %v336_v1  ;;  %v327_v14 = vld [vmem:[#allocation2 + $0x28] sm:$0xff]  ;;  %v329_v15 = vld [vmem:[#allocation2 + $0x38] sm:$0xff] }
  0x11   :  { %389 = vmatpush.bf16.msra.mxu2 %v336_v1  ;;  %390 = vmatpush.bf16.msra.mxu3 %v336_v1 }
  0x14   :  { %173 = vmatpush.bf16.msra.mxu0 %v335_v2  ;;  %391 = vmatpush.bf16.msra.mxu1 %v335_v2 }
  0x15   :  { %392 = vmatpush.bf16.msra.mxu2 %v335_v2  ;;  %393 = vmatpush.bf16.msra.mxu3 %v335_v2 }
  0x18   :  { %174 = vmatpush.bf16.msra.mxu0 %v334_v3  ;;  %394 = vmatpush.bf16.msra.mxu1 %v334_v3 }
  0x19   :  { %395 = vmatpush.bf16.msra.mxu2 %v334_v3  ;;  %396 = vmatpush.bf16.msra.mxu3 %v334_v3 }
  0x1c   :  { %175 = vmatpush.bf16.msra.mxu0 %v333_v4  ;;  %397 = vmatpush.bf16.msra.mxu1 %v333_v4 }
  0x1d   :  { %398 = vmatpush.bf16.msra.mxu2 %v333_v4  ;;  %399 = vmatpush.bf16.msra.mxu3 %v333_v4 }
  0x20   :  { %176 = vmatpush.bf16.msra.mxu0 %v332_v5  ;;  %400 = vmatpush.bf16.msra.mxu1 %v332_v5 }
  0x21   :  { %401 = vmatpush.bf16.msra.mxu2 %v332_v5  ;;  %402 = vmatpush.bf16.msra.mxu3 %v332_v5 }
  0x24   :  { %177 = vmatpush.bf16.msra.mxu0 %v331_v6  ;;  %403 = vmatpush.bf16.msra.mxu1 %v331_v6 }
  0x25   :  { %404 = vmatpush.bf16.msra.mxu2 %v331_v6  ;;  %405 = vmatpush.bf16.msra.mxu3 %v331_v6 }
  0x28   :  { %178 = vmatpush.bf16.msra.mxu0 %v330_v7  ;;  %406 = vmatpush.bf16.msra.mxu1 %v330_v7 }
  0x29   :  { %407 = vmatpush.bf16.msra.mxu2 %v330_v7  ;;  %408 = vmatpush.bf16.msra.mxu3 %v330_v7 }
  0x2b   :  { %179 = vmatmul.bf16.vlgmr.msra.gmra.mxu0 %v322_v8  ;;  %189 = vmatmul.bf16.vlgmr.msra.gmra.mxu1 %v324_v9 }
  0x2c   :  { %199 = vmatmul.bf16.vlgmr.msra.gmra.mxu2 %v326_v10  ;;  %209 = vmatmul.bf16.vlgmr.msra.gmra.mxu3 %v328_v11 }
  0x3b   :  { %184 = vmatmul.bf16.gmra.mxu0 %v323_v12  ;;  %194 = vmatmul.bf16.gmra.mxu1 %v325_v13 }
  0x3c   :  { %204 = vmatmul.bf16.gmra.mxu2 %v327_v14  ;;  %214 = vmatmul.bf16.gmra.mxu3 %v329_v15 }
  0xa8   :  { %v180_v16 = vpop.f32.mrf.mxu0  ;;  %v190_v17 = vpop.f32.mrf.mxu1 }
  0xaf   :  { %v200_v18 = vpop.f32.mrf.mxu2  ;;  %v210_v19 = vpop.f32.mrf.mxu3 }
  0xb0   :  { %v182_v20 = vpop.f32.mrf.mxu0  ;;  %v192_v21 = vpop.f32.mrf.mxu1 }
  0xb1   :  { %v341_v22 = vpack.c.bf16 %v182_v20, %v180_v16  ;;  %v351_v23 = vpack.c.bf16 %v192_v21, %v190_v17 }
  0xb3   :  { %342 = vst [vmem:[%s516_s2] sm:$0xff] %v341_v22  }
  0xb4   :  { %379 = vst [vmem:[%s516_s2 + $0x10] sm:$0xff] %v351_v23  }
  0xb7   :  { %v202_v24 = vpop.f32.mrf.mxu2  ;;  %v212_v25 = vpop.f32.mrf.mxu3 }
  0xb8   :  { %v361_v26 = vpack.c.bf16 %v202_v24, %v200_v18  ;;  %v371_v27 = vpack.c.bf16 %v212_v25, %v210_v19  ;;  %v185_v28 = vpop.f32.mrf.mxu0  ;;  %v195_v29 = vpop.f32.mrf.mxu1 }
  0xba   :  { %381 = vst [vmem:[%s516_s2 + $0x20] sm:$0xff] %v361_v26  }
  0xbb   :  { %383 = vst [vmem:[%s516_s2 + $0x30] sm:$0xff] %v371_v27  }
  0xbf   :  { %v205_v30 = vpop.f32.mrf.mxu2  ;;  %v215_v31 = vpop.f32.mrf.mxu3 }
  0xc0   :  { %v187_v32 = vpop.f32.mrf.mxu0  ;;  %v197_v33 = vpop.f32.mrf.mxu1 }
  0xc1   :  { %v346_v34 = vpack.c.bf16 %v187_v32, %v185_v28  ;;  %v356_v35 = vpack.c.bf16 %v197_v33, %v195_v29 }
  0xc3   :  { %378 = vst [vmem:[%s516_s2 + $0x8] sm:$0xff] %v346_v34  }
  0xc4   :  { %380 = vst [vmem:[%s516_s2 + $0x18] sm:$0xff] %v356_v35  }
  0xc7   :  { %v207_v36 = vpop.f32.mrf.mxu2  ;;  %v217_v37 = vpop.f32.mrf.mxu3 }
  0xc8   :  { %v366_v38 = vpack.c.bf16 %v207_v36, %v205_v30  ;;  %v376_v39 = vpack.c.bf16 %v217_v37, %v215_v31 }
  0xca   :  { %382 = vst [vmem:[%s516_s2 + $0x28] sm:$0xff] %v366_v38  }
  0xcb   :  { %384 = vst [vmem:[%s516_s2 + $0x38] sm:$0xff] %v376_v39  }
  0xcc   :  { %256 = vsyncpa [#allocation3], 1 }
  0xcd   :  { %257 = vsyncpa [#allocation5], 1 }

// kernel: supervised_graphsage_forward.5
= control target key start
LH: loop header
LB: loop body
LE: loop exit
PB: predicated region body
PF: predicated region fallthrough
CT: control target
= control target key end

     0   :  { %s899_s15 = smov 0   ;;  %s901_s16 = smov 0   ;;  %s991_s0 = inlined_call_operand.vmem [shape: bf16[128,128], index: 0, kind: input, shape index: {}]   ;;  %s992_s1 = inlined_call_operand.vmem [shape: bf16[128,128], index: 1, kind: input, shape index: {}]   ;;  %s993_s2 = inlined_call_operand.vmem [shape: bf16[128,128], index: 2, kind: input, shape index: {}]   ;;  %s994_s3 = inlined_call_operand.vmem [shape: bf16[128,128], index: 3, kind: input, shape index: {}]   ;;  %s995_s4 = inlined_call_operand.vmem [shape: bf16[128,128], index: 4, kind: output, shape index: {}]  }
   0x1   :  { %s903_s17 = smov 0  }
   0x2 LB: > { %s26_s18 = sadd.s32 1, %s868_s16  ;;  %p658_p0 = scmp.ge.s32.totalorder %s872_s17, 1  ;;  %s872_s17 = sphi %s903_s17, %s14_s17   ;;  %s868_s16 = sphi %s901_s16, %s997_s16   ;;  %s864_s15 = sphi %s899_s15, %s996_s15  }
   0x3   : > { %p28_p1 = scmp.ge.s32.totalorder %s26_s18, 2  ;;  %p191_p2 = scmp.lt.s32.totalorder %s872_s17, 3 }
   0x5   : > { %s999_s18 = smov (%p28_p1, %s26_s18), 0  ;;  %p192_p3 = pnand %p658_p0, %p191_p2 }
   0x6   : > { %s659_s9 = sshll.u32 (!%p192_p3), %s864_s15, 3 }
   0x7   : > { %195 = sbr.rel (%p192_p3) target bundleno = 208 (0xd0), region = 36  ;;  %p226_p4 = scmp.lt.s32.totalorder (!%p192_p3), %s659_s9, 15 }
   0xc   : > { %v774_v0 = vld [vmem:[%s994_s3 + $0x38] sm:$0xff]  ;;  %v773_v2 = vld [vmem:[%s994_s3 + $0x30] sm:$0xff]  ;;  %v772_v4 = vld [vmem:[%s994_s3 + $0x28] sm:$0xff]  ;;  %s1001_s9 = smov (!%p226_p4, %s659_s9), 15 }
   0xd   : > { %v782_v1 = vld [vmem:[%s993_s2 + $0x38] sm:$0xff]  ;;  %346 = vmatpush.bf16.msra.mxu0 %v774_v0  ;;  %810 = vmatpush.bf16.msra.mxu2 %v774_v0  ;;  %v781_v3 = vld [vmem:[%s993_s2 + $0x30] sm:$0xff]  ;;  %v780_v5 = vld [vmem:[%s993_s2 + $0x28] sm:$0xff]  ;;  %s962_s25 = sshll.u32 %s1001_s9, 2 }
   0xe   : > { %492 = vmatpush.bf16.msra.mxu1 %v782_v1  ;;  %818 = vmatpush.bf16.msra.mxu3 %v782_v1  ;;  %v771_v6 = vld [vmem:[%s994_s3 + $0x20] sm:$0xff]  ;;  %v770_v8 = vld [vmem:[%s994_s3 + $0x18] sm:$0xff]  ;;  %v769_v10 = vld [vmem:[%s994_s3 + $0x10] sm:$0xff]  ;;  %s229_s30 = scalar_lea.vmem %s991_s0, %s962_s25  ;;  %s238_s9 = scalar_lea.vmem %s992_s1, %s962_s25 }
   0xf   : > { %v779_v7 = vld [vmem:[%s993_s2 + $0x20] sm:$0xff]  ;;  %v778_v9 = vld [vmem:[%s993_s2 + $0x18] sm:$0xff]  ;;  %v777_v11 = vld [vmem:[%s993_s2 + $0x10] sm:$0xff]  ;;  %s244_s12 = scalar_lea.vmem %s995_s4, %s962_s25 }
  0x10   : > { %v768_v12 = vld [vmem:[%s994_s3 + $0x8] sm:$0xff]  ;;  %v767_v14 = vld [vmem:[%s994_s3] sm:$0xff]  ;;  %v765_v17 = vld [vmem:[%s229_s30 + $0x10] sm:$0xff] }
  0x11   : > { %347 = vmatpush.bf16.msra.mxu0 %v773_v2  ;;  %811 = vmatpush.bf16.msra.mxu2 %v773_v2  ;;  %v776_v13 = vld [vmem:[%s993_s2 + $0x8] sm:$0xff]  ;;  %v775_v15 = vld [vmem:[%s993_s2] sm:$0xff]  ;;  %v785_v19 = vld [vmem:[%s238_s9 + $0x10] sm:$0xff] }
  0x12   : > { %493 = vmatpush.bf16.msra.mxu1 %v781_v3  ;;  %819 = vmatpush.bf16.msra.mxu3 %v781_v3  ;;  %v763_v16 = vld [vmem:[%s229_s30] sm:$0xff]  ;;  %v764_v20 = vld [vmem:[%s229_s30 + $0x8] sm:$0xff]  ;;  %v766_v21 = vld [vmem:[%s229_s30 + $0x18] sm:$0xff] }
  0x13   : > { %v783_v18 = vld [vmem:[%s238_s9] sm:$0xff]  ;;  %v784_v22 = vld [vmem:[%s238_s9 + $0x8] sm:$0xff]  ;;  %v786_v23 = vld [vmem:[%s238_s9 + $0x18] sm:$0xff] }
  0x15   : > { %348 = vmatpush.bf16.msra.mxu0 %v772_v4  ;;  %812 = vmatpush.bf16.msra.mxu2 %v772_v4 }
  0x16   : > { %494 = vmatpush.bf16.msra.mxu1 %v780_v5  ;;  %820 = vmatpush.bf16.msra.mxu3 %v780_v5 }
  0x19   : > { %349 = vmatpush.bf16.msra.mxu0 %v771_v6  ;;  %813 = vmatpush.bf16.msra.mxu2 %v771_v6 }
  0x1a   : > { %495 = vmatpush.bf16.msra.mxu1 %v779_v7  ;;  %821 = vmatpush.bf16.msra.mxu3 %v779_v7 }
  0x1d   : > { %350 = vmatpush.bf16.msra.mxu0 %v770_v8  ;;  %814 = vmatpush.bf16.msra.mxu2 %v770_v8 }
  0x1e   : > { %496 = vmatpush.bf16.msra.mxu1 %v778_v9  ;;  %822 = vmatpush.bf16.msra.mxu3 %v778_v9 }
  0x21   : > { %351 = vmatpush.bf16.msra.mxu0 %v769_v10  ;;  %815 = vmatpush.bf16.msra.mxu2 %v769_v10 }
  0x22   : > { %497 = vmatpush.bf16.msra.mxu1 %v777_v11  ;;  %823 = vmatpush.bf16.msra.mxu3 %v777_v11 }
  0x25   : > { %352 = vmatpush.bf16.msra.mxu0 %v768_v12  ;;  %816 = vmatpush.bf16.msra.mxu2 %v768_v12 }
  0x26   : > { %498 = vmatpush.bf16.msra.mxu1 %v776_v13  ;;  %824 = vmatpush.bf16.msra.mxu3 %v776_v13 }
  0x29   : > { %353 = vmatpush.bf16.msra.mxu0 %v767_v14  ;;  %817 = vmatpush.bf16.msra.mxu2 %v767_v14 }
  0x2a   : > { %499 = vmatpush.bf16.msra.mxu1 %v775_v15  ;;  %825 = vmatpush.bf16.msra.mxu3 %v775_v15 }
  0x2c   : > { %354 = vmatmul.bf16.vlgmr.msra.gmra.mxu0 %v763_v16  ;;  %364 = vmatmul.bf16.vlgmr.msra.gmra.mxu2 %v765_v17 }
  0x2d   : > { %500 = vmatmul.bf16.vlgmr.msra.gmra.mxu1 %v783_v18  ;;  %510 = vmatmul.bf16.vlgmr.msra.gmra.mxu3 %v785_v19 }
  0x3c   : > { %359 = vmatmul.bf16.gmra.mxu0 %v764_v20  ;;  %369 = vmatmul.bf16.gmra.mxu2 %v766_v21 }
  0x3d   : > { %505 = vmatmul.bf16.gmra.mxu1 %v784_v22  ;;  %515 = vmatmul.bf16.gmra.mxu3 %v786_v23 }
  0xa9   : > { %v355_v24 = vpop.f32.mrf.mxu0 }
  0xaa   : > { %v501_v25 = vpop.f32.mrf.mxu1 }
  0xab   : > { %v521_v28 = vadd.f32 %v501_v25, %v355_v24 }
  0xad   : > { %v548_v32 = vmax.f32 %v521_v28, 0.0 }
  0xaf   : > { %v365_v26 = vpop.f32.mrf.mxu2 }
  0xb0   : > { %v511_v27 = vpop.f32.mrf.mxu3 }
  0xb1   : > { %v357_v29 = vpop.f32.mrf.mxu0  ;;  %v525_v34 = vadd.f32 %v511_v27, %v365_v26 }
  0xb2   : > { %v503_v30 = vpop.f32.mrf.mxu1 }
  0xb3   : > { %v522_v31 = vadd.f32 %v503_v30, %v357_v29  ;;  %v552_v41 = vmax.f32 %v525_v34, 0.0 }
  0xb5   : > { %v549_v33 = vmax.f32 %v522_v31, 0.0 }
  0xb7   : > { %v790_v35 = vpack.c.bf16 %v549_v33, %v548_v32  ;;  %v367_v36 = vpop.f32.mrf.mxu2 }
  0xb8   : > { %v513_v37 = vpop.f32.mrf.mxu3 }
  0xb9   : > { %791 = vst [vmem:[%s244_s12] sm:$0xff] %v790_v35   ;;  %v526_v38 = vadd.f32 %v513_v37, %v367_v36  ;;  %v360_v39 = vpop.f32.mrf.mxu0 }
  0xba   : > { %v506_v40 = vpop.f32.mrf.mxu1 }
  0xbb   : > { %v553_v42 = vmax.f32 %v526_v38, 0.0  ;;  %v523_v46 = vadd.f32 %v506_v40, %v360_v39 }
  0xbd   : > { %v800_v43 = vpack.c.bf16 %v553_v42, %v552_v41  ;;  %v550_v50 = vmax.f32 %v523_v46, 0.0 }
  0xbf   : > { %808 = vst [vmem:[%s244_s12 + $0x10] sm:$0xff] %v800_v43   ;;  %v370_v44 = vpop.f32.mrf.mxu2 }
  0xc0   : > { %v516_v45 = vpop.f32.mrf.mxu3 }
  0xc1   : > { %v362_v47 = vpop.f32.mrf.mxu0  ;;  %v527_v52 = vadd.f32 %v516_v45, %v370_v44 }
  0xc2   : > { %v508_v48 = vpop.f32.mrf.mxu1 }
  0xc3   : > { %v524_v49 = vadd.f32 %v508_v48, %v362_v47  ;;  %v554_v57 = vmax.f32 %v527_v52, 0.0 }
  0xc5   : > { %v551_v51 = vmax.f32 %v524_v49, 0.0 }
  0xc7   : > { %v795_v53 = vpack.c.bf16 %v551_v51, %v550_v50  ;;  %v372_v54 = vpop.f32.mrf.mxu2 }
  0xc8   : > { %v518_v55 = vpop.f32.mrf.mxu3 }
  0xc9   : > { %807 = vst [vmem:[%s244_s12 + $0x8] sm:$0xff] %v795_v53   ;;  %v528_v56 = vadd.f32 %v518_v55, %v372_v54 }
  0xcb   : > { %v555_v58 = vmax.f32 %v528_v56, 0.0 }
  0xcd   : > { %v805_v59 = vpack.c.bf16 %v555_v58, %v554_v57 }
  0xcf   : > { %809 = vst [vmem:[%s244_s12 + $0x18] sm:$0xff] %v805_v59  }
  0xd0 PF: > { %s14_s17 = sadd.s32 1, %s872_s17   ;;  %s996_s15 = smov %s868_s16 }
  0xd1   : > { %p11_p5 = scmp.ge.s32.totalorder %s14_s17, 4   ;;  %s997_s16 = smov %s999_s18 }
  0xd3   :  { %13 = sbr.rel (!%p11_p5) target bundleno = 2 (0x2), region = 78 }

// kernel: supervised_graphsage_forward.7
= control target key start
LH: loop header
LB: loop body
LE: loop exit
PB: predicated region body
PF: predicated region fallthrough
CT: control target
= control target key end

     0   :  { %s853_s18 = smov 0   ;;  %s855_s19 = smov 0   ;;  %s968_s0 = inlined_call_operand.vmem [shape: bf16[32,128], index: 0, kind: input, shape index: {}]   ;;  %s969_s1 = inlined_call_operand.vmem [shape: bf16[32,128], index: 1, kind: input, shape index: {}]   ;;  %s970_s2 = inlined_call_operand.vmem [shape: bf16[128,128], index: 2, kind: input, shape index: {}]   ;;  %s971_s3 = inlined_call_operand.vmem [shape: bf16[128,128], index: 3, kind: input, shape index: {}]   ;;  %s972_s4 = inlined_call_operand.vmem [shape: bf16[128,128], index: 4, kind: input, shape index: {}]   ;;  %s973_s5 = inlined_call_operand.vmem [shape: f32[32,128], index: 5, kind: output, shape index: {}]  }
   0x1   :  { %s857_s20 = smov 0  }
   0x2 LB: > { %s27_s21 = sadd.s32 1, %s817_s19  ;;  %p636_p0 = scmp.ge.s32.totalorder %s821_s20, 1  ;;  %s821_s20 = sphi %s857_s20, %s15_s20   ;;  %s817_s19 = sphi %s855_s19, %s975_s19   ;;  %s813_s18 = sphi %s853_s18, %s974_s18  }
   0x3   : > { %p29_p1 = scmp.ge.s32.totalorder %s27_s21, 2  ;;  %p216_p2 = scmp.lt.s32.totalorder %s821_s20, 3 }
   0x5   : > { %s977_s21 = smov (%p29_p1, %s27_s21), 0  ;;  %p217_p3 = pnand %p636_p0, %p216_p2 }
   0x6   : > { %s637_s23 = sshll.u32 (!%p217_p3), %s813_s18, 1 }
   0x7   : > { %220 = sbr.rel (%p217_p3) target bundleno = 326 (0x146), region = 40  ;;  %p253_p4 = scmp.lt.s32.totalorder (!%p217_p3), %s637_s23, 3 }
   0xc   : > { %v757_v0 = vld [vmem:[%s971_s3 + $0x38] sm:$0xff]  ;;  %v756_v2 = vld [vmem:[%s971_s3 + $0x30] sm:$0xff]  ;;  %v755_v5 = vld [vmem:[%s971_s3 + $0x28] sm:$0xff]  ;;  %s979_s23 = smov (!%p253_p4, %s637_s23), 3 }
   0xd   : > { %v765_v1 = vld [vmem:[%s970_s2 + $0x38] sm:$0xff]  ;;  %349 = vmatpush.bf16.msra.mxu0 %v757_v0  ;;  %v764_v3 = vld [vmem:[%s970_s2 + $0x30] sm:$0xff]  ;;  %v763_v6 = vld [vmem:[%s970_s2 + $0x28] sm:$0xff]  ;;  %s638_s12 = sshll.u32 %s979_s23, 2  ;;  %s642_s10 = sshll.u32 %s979_s23, 3 }
   0xe   : > { %444 = vmatpush.bf16.msra.mxu1 %v765_v1  ;;  %v774_v4 = vld [vmem:[%s972_s4 + $0x38] sm:$0xff]  ;;  %v773_v7 = vld [vmem:[%s972_s4 + $0x30] sm:$0xff]  ;;  %v754_v8 = vld [vmem:[%s971_s3 + $0x20] sm:$0xff]  ;;  %s256_s24 = scalar_lea.vmem %s968_s0, %s638_s12  ;;  %s265_s27 = scalar_lea.vmem %s969_s1, %s638_s12 }
   0xf   : > { %534 = vmatpush.bf16.msra.mxu2 %v774_v4  ;;  %v762_v9 = vld [vmem:[%s970_s2 + $0x20] sm:$0xff]  ;;  %v772_v10 = vld [vmem:[%s972_s4 + $0x28] sm:$0xff]  ;;  %v753_v11 = vld [vmem:[%s971_s3 + $0x18] sm:$0xff]  ;;  %s271_s13 = scalar_lea.vmem %s973_s5, %s642_s10 }
  0x10   : > { %v761_v12 = vld [vmem:[%s970_s2 + $0x18] sm:$0xff]  ;;  %v771_v13 = vld [vmem:[%s972_s4 + $0x20] sm:$0xff]  ;;  %v752_v14 = vld [vmem:[%s971_s3 + $0x10] sm:$0xff] }
  0x11   : > { %350 = vmatpush.bf16.msra.mxu0 %v756_v2  ;;  %v760_v15 = vld [vmem:[%s970_s2 + $0x10] sm:$0xff]  ;;  %v751_v16 = vld [vmem:[%s971_s3 + $0x8] sm:$0xff]  ;;  %v750_v18 = vld [vmem:[%s971_s3] sm:$0xff] }
  0x12   : > { %445 = vmatpush.bf16.msra.mxu1 %v764_v3  ;;  %v759_v17 = vld [vmem:[%s970_s2 + $0x8] sm:$0xff]  ;;  %v758_v19 = vld [vmem:[%s970_s2] sm:$0xff]  ;;  %v770_v22 = vld [vmem:[%s972_s4 + $0x18] sm:$0xff] }
  0x13   : > { %535 = vmatpush.bf16.msra.mxu2 %v773_v7  ;;  %v749_v20 = vld [vmem:[%s256_s24] sm:$0xff]  ;;  %v769_v23 = vld [vmem:[%s972_s4 + $0x10] sm:$0xff]  ;;  %v768_v24 = vld [vmem:[%s972_s4 + $0x8] sm:$0xff] }
  0x14   : > { %v766_v21 = vld [vmem:[%s265_s27] sm:$0xff] }
  0x15   : > { %351 = vmatpush.bf16.msra.mxu0 %v755_v5  ;;  %v767_v25 = vld [vmem:[%s972_s4] sm:$0xff] }
  0x16   : > { %446 = vmatpush.bf16.msra.mxu1 %v763_v6 }
  0x17   : > { %536 = vmatpush.bf16.msra.mxu2 %v772_v10 }
  0x19   : > { %352 = vmatpush.bf16.msra.mxu0 %v754_v8 }
  0x1a   : > { %447 = vmatpush.bf16.msra.mxu1 %v762_v9 }
  0x1b   : > { %537 = vmatpush.bf16.msra.mxu2 %v771_v13 }
  0x1d   : > { %353 = vmatpush.bf16.msra.mxu0 %v753_v11 }
  0x1e   : > { %448 = vmatpush.bf16.msra.mxu1 %v761_v12 }
  0x1f   : > { %538 = vmatpush.bf16.msra.mxu2 %v770_v22 }
  0x21   : > { %354 = vmatpush.bf16.msra.mxu0 %v752_v14 }
  0x22   : > { %449 = vmatpush.bf16.msra.mxu1 %v760_v15 }
  0x23   : > { %539 = vmatpush.bf16.msra.mxu2 %v769_v23 }
  0x25   : > { %355 = vmatpush.bf16.msra.mxu0 %v751_v16 }
  0x26   : > { %450 = vmatpush.bf16.msra.mxu1 %v759_v17 }
  0x27   : > { %540 = vmatpush.bf16.msra.mxu2 %v768_v24 }
  0x29   : > { %356 = vmatpush.bf16.msra.mxu0 %v750_v18 }
  0x2a   : > { %451 = vmatpush.bf16.msra.mxu1 %v758_v19 }
  0x2b   : > { %541 = vmatpush.bf16.msra.mxu2 %v767_v25 }
  0x2c   : > { %357 = vmatmul.bf16.vlgmr.msra.gmra.mxu0 %v749_v20 }
  0x2d   : > { %452 = vmatmul.bf16.vlgmr.msra.gmra.mxu1 %v766_v21 }
  0xa9   : > { %v358_v26 = vpop.f32.mrf.mxu0 }
  0xaa   : > { %v453_v27 = vpop.f32.mrf.mxu1 }
  0xab   : > { %v458_v28 = vadd.f32 %v453_v27, %v358_v26 }
  0xad   : > { %v467_v32 = vmax.f32 %v458_v28, 0.0 }
  0xb1   : > { %v360_v29 = vpop.f32.mrf.mxu0 }
  0xb2   : > { %v455_v30 = vpop.f32.mrf.mxu1 }
  0xb3   : > { %v459_v31 = vadd.f32 %v455_v30, %v360_v29 }
  0xb5   : > { %v468_v33 = vmax.f32 %v459_v31, 0.0 }
  0xb7   : > { %v469_v34 = vpack.c.bf16 %v468_v33, %v467_v32 }
  0xb9   : > { %542 = vmatmul.bf16.vlgmr.msra.gmra.mxu2 %v469_v34 }
 0x13c   : > { %v543_v35 = vpop.f32.mrf.mxu2 }
 0x13d   : > { %548 = vst [vmem:[%s271_s13] sm:$0xff] %v543_v35 }
 0x144   : > { %v545_v36 = vpop.f32.mrf.mxu2 }
 0x145   : > { %549 = vst [vmem:[%s271_s13 + $0x8] sm:$0xff] %v545_v36 }
 0x146 PF: > { %s15_s20 = sadd.s32 1, %s821_s20   ;;  %s974_s18 = smov %s817_s19 }
 0x147   : > { %p12_p5 = scmp.ge.s32.totalorder %s15_s20, 4   ;;  %s975_s19 = smov %s977_s21 }
 0x149   :  { %14 = sbr.rel (!%p12_p5) target bundleno = 2 (0x2), region = 82 }

// kernel: supervised_graphsage_forward.6
= control target key start
LH: loop header
LB: loop body
LE: loop exit
PB: predicated region body
PF: predicated region fallthrough
CT: control target
= control target key end

     0   :  { %s462_s1 = inlined_call_operand.vmem [shape: bf16[128,128], index: 1, kind: input, shape index: {}]   ;;  %s463_s0 = inlined_call_operand.vmem [shape: bf16[128,128], index: 0, kind: input, shape index: {}]   ;;  %s464_s2 = inlined_call_operand.vmem [shape: bf16[128,128], index: 2, kind: output, shape index: {}]  }
   0x1   :  { %v303_v0 = vld [vmem:[%s462_s1 + $0x38] sm:$0xff]  ;;  %v302_v1 = vld [vmem:[%s462_s1 + $0x30] sm:$0xff]  ;;  %v301_v2 = vld [vmem:[%s462_s1 + $0x28] sm:$0xff] }
   0x2   :  { %139 = vmatpush.bf16.msra.mxu0 %v303_v0  ;;  %351 = vmatpush.bf16.msra.mxu1 %v303_v0  ;;  %v300_v3 = vld [vmem:[%s462_s1 + $0x20] sm:$0xff]  ;;  %v299_v4 = vld [vmem:[%s462_s1 + $0x18] sm:$0xff]  ;;  %v298_v5 = vld [vmem:[%s462_s1 + $0x10] sm:$0xff] }
   0x3   :  { %352 = vmatpush.bf16.msra.mxu2 %v303_v0  ;;  %353 = vmatpush.bf16.msra.mxu3 %v303_v0  ;;  %v297_v6 = vld [vmem:[%s462_s1 + $0x8] sm:$0xff]  ;;  %v296_v7 = vld [vmem:[%s462_s1] sm:$0xff]  ;;  %v290_v9 = vld [vmem:[%s463_s0 + $0x10] sm:$0xff] }
   0x4   :  { %v288_v8 = vld [vmem:[%s463_s0] sm:$0xff]  ;;  %v294_v11 = vld [vmem:[%s463_s0 + $0x30] sm:$0xff]  ;;  %v289_v12 = vld [vmem:[%s463_s0 + $0x8] sm:$0xff] }
   0x5   :  { %v292_v10 = vld [vmem:[%s463_s0 + $0x20] sm:$0xff]  ;;  %v291_v13 = vld [vmem:[%s463_s0 + $0x18] sm:$0xff]  ;;  %v293_v14 = vld [vmem:[%s463_s0 + $0x28] sm:$0xff] }
   0x6   :  { %140 = vmatpush.bf16.msra.mxu0 %v302_v1  ;;  %354 = vmatpush.bf16.msra.mxu1 %v302_v1  ;;  %v295_v15 = vld [vmem:[%s463_s0 + $0x38] sm:$0xff] }
   0x7   :  { %355 = vmatpush.bf16.msra.mxu2 %v302_v1  ;;  %356 = vmatpush.bf16.msra.mxu3 %v302_v1 }
   0xa   :  { %141 = vmatpush.bf16.msra.mxu0 %v301_v2  ;;  %357 = vmatpush.bf16.msra.mxu1 %v301_v2 }
   0xb   :  { %358 = vmatpush.bf16.msra.mxu2 %v301_v2  ;;  %359 = vmatpush.bf16.msra.mxu3 %v301_v2 }
   0xe   :  { %142 = vmatpush.bf16.msra.mxu0 %v300_v3  ;;  %360 = vmatpush.bf16.msra.mxu1 %v300_v3 }
   0xf   :  { %361 = vmatpush.bf16.msra.mxu2 %v300_v3  ;;  %362 = vmatpush.bf16.msra.mxu3 %v300_v3 }
  0x12   :  { %143 = vmatpush.bf16.msra.mxu0 %v299_v4  ;;  %363 = vmatpush.bf16.msra.mxu1 %v299_v4 }
  0x13   :  { %364 = vmatpush.bf16.msra.mxu2 %v299_v4  ;;  %365 = vmatpush.bf16.msra.mxu3 %v299_v4 }
  0x16   :  { %144 = vmatpush.bf16.msra.mxu0 %v298_v5  ;;  %366 = vmatpush.bf16.msra.mxu1 %v298_v5 }
  0x17   :  { %367 = vmatpush.bf16.msra.mxu2 %v298_v5  ;;  %368 = vmatpush.bf16.msra.mxu3 %v298_v5 }
  0x1a   :  { %145 = vmatpush.bf16.msra.mxu0 %v297_v6  ;;  %369 = vmatpush.bf16.msra.mxu1 %v297_v6 }
  0x1b   :  { %370 = vmatpush.bf16.msra.mxu2 %v297_v6  ;;  %371 = vmatpush.bf16.msra.mxu3 %v297_v6 }
  0x1e   :  { %146 = vmatpush.bf16.msra.mxu0 %v296_v7  ;;  %372 = vmatpush.bf16.msra.mxu1 %v296_v7 }
  0x1f   :  { %373 = vmatpush.bf16.msra.mxu2 %v296_v7  ;;  %374 = vmatpush.bf16.msra.mxu3 %v296_v7 }
  0x21   :  { %147 = vmatmul.bf16.vlgmr.msra.gmra.mxu0 %v288_v8  ;;  %157 = vmatmul.bf16.vlgmr.msra.gmra.mxu1 %v290_v9 }
  0x22   :  { %167 = vmatmul.bf16.vlgmr.msra.gmra.mxu2 %v292_v10  ;;  %177 = vmatmul.bf16.vlgmr.msra.gmra.mxu3 %v294_v11 }
  0x31   :  { %152 = vmatmul.bf16.gmra.mxu0 %v289_v12  ;;  %162 = vmatmul.bf16.gmra.mxu1 %v291_v13 }
  0x32   :  { %172 = vmatmul.bf16.gmra.mxu2 %v293_v14  ;;  %182 = vmatmul.bf16.gmra.mxu3 %v295_v15 }
  0x9e   :  { %v148_v16 = vpop.f32.mrf.mxu0  ;;  %v158_v17 = vpop.f32.mrf.mxu1 }
  0xa5   :  { %v168_v18 = vpop.f32.mrf.mxu2  ;;  %v178_v19 = vpop.f32.mrf.mxu3 }
  0xa6   :  { %v150_v20 = vpop.f32.mrf.mxu0  ;;  %v160_v21 = vpop.f32.mrf.mxu1 }
  0xa7   :  { %v307_v22 = vpack.c.bf16 %v150_v20, %v148_v16  ;;  %v317_v23 = vpack.c.bf16 %v160_v21, %v158_v17 }
  0xa9   :  { %308 = vst [vmem:[%s464_s2] sm:$0xff] %v307_v22  }
  0xaa   :  { %345 = vst [vmem:[%s464_s2 + $0x10] sm:$0xff] %v317_v23  }
  0xad   :  { %v170_v24 = vpop.f32.mrf.mxu2  ;;  %v180_v25 = vpop.f32.mrf.mxu3 }
  0xae   :  { %v327_v26 = vpack.c.bf16 %v170_v24, %v168_v18  ;;  %v337_v27 = vpack.c.bf16 %v180_v25, %v178_v19  ;;  %v153_v28 = vpop.f32.mrf.mxu0  ;;  %v163_v29 = vpop.f32.mrf.mxu1 }
  0xb0   :  { %347 = vst [vmem:[%s464_s2 + $0x20] sm:$0xff] %v327_v26  }
  0xb1   :  { %349 = vst [vmem:[%s464_s2 + $0x30] sm:$0xff] %v337_v27  }
  0xb5   :  { %v173_v30 = vpop.f32.mrf.mxu2  ;;  %v183_v31 = vpop.f32.mrf.mxu3 }
  0xb6   :  { %v155_v32 = vpop.f32.mrf.mxu0  ;;  %v165_v33 = vpop.f32.mrf.mxu1 }
  0xb7   :  { %v312_v34 = vpack.c.bf16 %v155_v32, %v153_v28  ;;  %v322_v35 = vpack.c.bf16 %v165_v33, %v163_v29 }
  0xb9   :  { %344 = vst [vmem:[%s464_s2 + $0x8] sm:$0xff] %v312_v34  }
  0xba   :  { %346 = vst [vmem:[%s464_s2 + $0x18] sm:$0xff] %v322_v35  }
  0xbd   :  { %v175_v36 = vpop.f32.mrf.mxu2  ;;  %v185_v37 = vpop.f32.mrf.mxu3 }
  0xbe   :  { %v332_v38 = vpack.c.bf16 %v175_v36, %v173_v30  ;;  %v342_v39 = vpack.c.bf16 %v185_v37, %v183_v31 }
  0xc0   :  { %348 = vst [vmem:[%s464_s2 + $0x28] sm:$0xff] %v332_v38  }
  0xc1   :  { %350 = vst [vmem:[%s464_s2 + $0x38] sm:$0xff] %v342_v39  }

</bundles_post_ra>
